<compile_context>
chip_gen: v7x
topology: tpu7x:2x2x1
jax: 0.10.0
libtpu: 0.0.40
codegen_flags: <defaults>
</compile_context>

<pallas_src>
import jax
import jax.numpy as jnp
from jax.experimental import pallas as pl
from jax.experimental.pallas import tpu as pltpu

_MIB = 1024 * 1024


def _round_up(x, m):
    return ((x + m - 1) // m) * m


def _vmem_capacity_bytes():
    try:
        cap = int(pltpu.get_tpu_info().vmem_capacity_bytes)
        if cap > 0:
            return cap
    except Exception:
        pass
    return 128 * _MIB


# ----------------------------------------------------------------------------- kernels

def ffn_kernel_resident(x_ref, w1_ref, b1_ref, w2_ref, b2_ref, o_ref):
    """Whole d_ff in one shot; weights stay resident in VMEM across all token tiles."""
    x = x_ref[...].astype(w1_ref.dtype)
    h = jnp.dot(x, w1_ref[...], preferred_element_type=jnp.float32)
    h = jnp.maximum(h + b1_ref[...], 0.0)
    # TODO(synk): nn.Dropout is identity in eval mode; a training-mode mask would be
    # drawn here with pltpu.prng_seed / pltpu.prng_random_bits.
    y = jnp.dot(h.astype(w2_ref.dtype), w2_ref[...], preferred_element_type=jnp.float32)
    o_ref[...] = (y + b2_ref[...]).astype(o_ref.dtype)


def ffn_kernel_streamed_f32(x_ref, w1_ref, b1_ref, w2_ref, b2_ref, o_ref):
    """d_ff streamed in chunks; f32 output accumulated directly in the resident o tile."""
    k = pl.program_id(1)
    x = x_ref[...].astype(w1_ref.dtype)
    h = jnp.dot(x, w1_ref[...], preferred_element_type=jnp.float32)
    h = jnp.maximum(h + b1_ref[...], 0.0)
    contrib = jnp.dot(h.astype(w2_ref.dtype), w2_ref[...],
                      preferred_element_type=jnp.float32)

    @pl.when(k == 0)
    def _():
        o_ref[...] = contrib + b2_ref[...]

    @pl.when(k > 0)
    def _():
        o_ref[...] += contrib


def ffn_kernel_streamed_acc(x_ref, w1_ref, b1_ref, w2_ref, b2_ref, o_ref, acc_ref):
    """d_ff streamed in chunks; f32 scratch accumulator for non-f32 outputs."""
    k = pl.program_id(1)

    @pl.when(k == 0)
    def _():
        acc_ref[...] = jnp.zeros_like(acc_ref)

    x = x_ref[...].astype(w1_ref.dtype)
    h = jnp.dot(x, w1_ref[...], preferred_element_type=jnp.float32)
    h = jnp.maximum(h + b1_ref[...], 0.0)
    acc_ref[...] += jnp.dot(h.astype(w2_ref.dtype), w2_ref[...],
                            preferred_element_type=jnp.float32)

    @pl.when(k == pl.num_programs(1) - 1)
    def _():
        o_ref[...] = (acc_ref[...] + b2_ref[...]).astype(o_ref.dtype)


# ----------------------------------------------------------------------------- wrapper

def _tile_vmem_bytes(tm, tk, d_model, in_sz, out_sz, mxu_sz, use_acc):
    """Conservative per-call VMEM estimate (double-buffered I/O + in-kernel temps)."""
    return (
        2 * tm * d_model * in_sz          # x tiles (double-buffered, original dtype)
        + 2 * d_model * tk * mxu_sz       # W1 buffers
        + 2 * tk * d_model * mxu_sz       # W2 buffers
        + 2 * tk * 4 + 2 * d_model * 4    # b1 / b2
        + 2 * tm * d_model * out_sz       # output tiles
        + tm * tk * (4 + mxu_sz)          # h (f32) + its bf16 cast
        + tm * d_model * mxu_sz           # in-kernel bf16 cast of x
        + (tm * d_model * 4 if use_acc else 0)
    )


def positionwise_feed_forward(x, w1, b1, w2, b2, *, tile_m=512, tile_k=1024,
                              mxu_dtype=jnp.bfloat16, force_streamed=False):
    """x: (B, S, d_model) -> (B, S, d_model). Weights stored as (in, out)."""
    B, S, d_model = x.shape
    d_ff = w1.shape[1]
    M = B * S

    out_dtype = x.dtype
    in_sz = jnp.dtype(x.dtype).itemsize
    out_sz = jnp.dtype(out_dtype).itemsize
    mxu_sz = jnp.dtype(mxu_dtype).itemsize
    f32_out = jnp.dtype(out_dtype) == jnp.dtype(jnp.float32)

    vmem_cap = max(32 * _MIB, _vmem_capacity_bytes() - 16 * _MIB)
    margin = 8 * _MIB

    # --- token tile ----------------------------------------------------------
    # bf16 min sublane tile is 16 rows; keep everything a multiple of 16.
    m16 = _round_up(max(M, 1), 16)
    tm = min(_round_up(tile_m, 16), m16)
    # Keep >=2 steps on the parallel axis for medium/large inputs so both v7x
    # TensorCores get work (harmless on single-TC v5e/v6e).
    if m16 >= 2 * 256 and -(-m16 // tm) < 2:
        tm = _round_up(-(-m16 // 2), 16)

    # --- path selection ------------------------------------------------------
    resident = (not force_streamed) and (
        _tile_vmem_bytes(tm, d_ff, d_model, in_sz, out_sz, mxu_sz, False) + margin
        <= vmem_cap)

    if resident:
        tk = d_ff
    else:
        use_acc = not f32_out
        # Shrink tm (never below 16) until a 128-wide d_ff chunk fits the budget.
        while (tm > 16 and
               _tile_vmem_bytes(tm, 128, d_model, in_sz, out_sz, mxu_sz,
                                use_acc) + margin > vmem_cap):
            tm = max(16, _round_up(tm // 2, 16))
        # Largest 128-multiple d_ff chunk <= tile_k that fits the budget.
        tk = 128
        for c in sorted({_round_up(tile_k, 128), 1024, 512, 256, 128}, reverse=True):
            if c > _round_up(d_ff, 128):
                continue
            if (_tile_vmem_bytes(tm, c, d_model, in_sz, out_sz, mxu_sz, use_acc)
                    + margin <= vmem_cap):
                tk = c
                break

    M_pad = _round_up(M, tm)

    # --- operands ------------------------------------------------------------
    x2d = x.reshape(M, d_model)
    if M_pad != M:
        x2d = jnp.pad(x2d, ((0, M_pad - M), (0, 0)))
    # x stays in its input dtype; the bf16 cast happens in-kernel (no extra HBM pass).

    w1c = w1.astype(mxu_dtype).reshape(d_model, d_ff)
    w2c = w2.astype(mxu_dtype).reshape(d_ff, d_model)
    b1c = b1.astype(jnp.float32).reshape(1, d_ff)
    b2c = b2.astype(jnp.float32).reshape(1, d_model)

    d_ff_eff = d_ff
    if not resident:
        d_ff_eff = _round_up(d_ff, tk)
        if d_ff_eff != d_ff:
            pad = d_ff_eff - d_ff
            # Zero-padded W2 rows make the padded d_ff columns contribute nothing.
            w1c = jnp.pad(w1c, ((0, 0), (0, pad)))
            b1c = jnp.pad(b1c, ((0, 0), (0, pad)))
            w2c = jnp.pad(w2c, ((0, pad), (0, 0)))

    # --- grid / specs --------------------------------------------------------
    if resident:
        grid = (M_pad // tm,)
        kernel = ffn_kernel_resident
        in_specs = [
            pl.BlockSpec((tm, d_model), lambda i: (i, 0)),        # x tile
            pl.BlockSpec((d_model, d_ff), lambda i: (0, 0)),      # W1 (fetched once)
            pl.BlockSpec((1, d_ff), lambda i: (0, 0)),            # b1 (fetched once)
            pl.BlockSpec((d_ff, d_model), lambda i: (0, 0)),      # W2 (fetched once)
            pl.BlockSpec((1, d_model), lambda i: (0, 0)),         # b2 (fetched once)
        ]
        out_specs = pl.BlockSpec((tm, d_model), lambda i: (i, 0))
        scratch_shapes = []
        dim_sem = ("parallel",)
        use_acc = False
    else:
        grid = (M_pad // tm, d_ff_eff // tk)
        kernel = ffn_kernel_streamed_f32 if f32_out else ffn_kernel_streamed_acc
        in_specs = [
            pl.BlockSpec((tm, d_model), lambda i, k: (i, 0)),     # x tile (constant over k)
            pl.BlockSpec((d_model, tk), lambda i, k: (0, k)),     # W1 chunk
            pl.BlockSpec((1, tk), lambda i, k: (0, k)),           # b1 chunk
            pl.BlockSpec((tk, d_model), lambda i, k: (k, 0)),     # W2 chunk
            pl.BlockSpec((1, d_model), lambda i, k: (0, 0)),      # b2 (resident)
        ]
        out_specs = pl.BlockSpec((tm, d_model), lambda i, k: (i, 0))
        use_acc = not f32_out
        scratch_shapes = ([pltpu.VMEM((tm, d_model), jnp.float32)] if use_acc else [])
        dim_sem = ("parallel", "arbitrary")

    vmem_needed = _tile_vmem_bytes(tm, tk, d_model, in_sz, out_sz, mxu_sz, use_acc)
    vmem_limit = int(min(vmem_cap, max(32 * _MIB, vmem_needed + margin)))

    n_i = M_pad // tm
    weight_bytes = 2 * d_model * d_ff_eff * mxu_sz
    cost = pl.CostEstimate(
        flops=2 * 2 * M_pad * d_model * d_ff_eff,
        transcendentals=0,
        bytes_accessed=(M_pad * d_model * (in_sz + out_sz)
                        + weight_bytes * (1 if resident else n_i)
                        + (d_ff_eff + d_model) * 4),
    )

    out2d = pl.pallas_call(
        kernel,
        out_shape=jax.ShapeDtypeStruct((M_pad, d_model), out_dtype),
        grid_spec=pltpu.PrefetchScalarGridSpec(
            num_scalar_prefetch=0,
            grid=grid,
            in_specs=in_specs,
            out_specs=out_specs,
            scratch_shapes=scratch_shapes,
        ),
        compiler_params=pltpu.CompilerParams(
            dimension_semantics=dim_sem,
            vmem_limit_bytes=vmem_limit,
        ),
        cost_estimate=cost,
    )(x2d, w1c, b1c, w2c, b2c)

    if M_pad != M:
        out2d = out2d[:M]
    return out2d.reshape(B, S, d_model)


def init_params(key, d_model, d_ff, dtype=jnp.float32):
    # Mimics nn.Linear's uniform(-1/sqrt(fan_in), 1/sqrt(fan_in)); weights stored as (in, out).
    k1, k2, k3, k4 = jax.random.split(key, 4)
    bound1 = 1.0 / jnp.sqrt(d_model)
    bound2 = 1.0 / jnp.sqrt(d_ff)
    w1 = jax.random.uniform(k1, (d_model, d_ff), dtype, -bound1, bound1)
    b1 = jax.random.uniform(k2, (1, d_ff), dtype, -bound1, bound1)
    w2 = jax.random.uniform(k3, (d_ff, d_model), dtype, -bound2, bound2)
    b2 = jax.random.uniform(k4, (1, d_model), dtype, -bound2, bound2)
    return w1, b1, w2, b2


if __name__ == "__main__":
    B, S, d_model, d_ff = 2, 8, 32, 64

    key = jax.random.PRNGKey(0)
    kx, kp = jax.random.split(key)
    x = jax.random.normal(kx, (B, S, d_model), jnp.float32)
    w1, b1, w2, b2 = init_params(kp, d_model, d_ff)

    # Reference mirroring the kernel's bf16 MXU inputs / f32 accumulation (eval dropout = id).
    f32 = jnp.float32
    xb = x.reshape(-1, d_model).astype(jnp.bfloat16).astype(f32)
    w1b = w1.astype(jnp.bfloat16).astype(f32)
    w2b = w2.astype(jnp.bfloat16).astype(f32)
    h = jnp.maximum(xb @ w1b + b1.astype(f32), 0.0)
    ref = (h.astype(jnp.bfloat16).astype(f32) @ w2b + b2.astype(f32)).reshape(B, S, d_model)

    # 1) Weights-resident fast path (default for these sizes).
    out = jax.block_until_ready(positionwise_feed_forward(x, w1, b1, w2, b2))
    assert out.shape == (B, S, d_model)
    err = float(jnp.max(jnp.abs(out.astype(f32) - ref)))
    assert jnp.allclose(out.astype(f32), ref, atol=2e-3, rtol=2e-3), err

    # 2) Streamed-d_ff path (forced; f32 output accumulates straight into o_ref).
    out_s = jax.block_until_ready(
        positionwise_feed_forward(x, w1, b1, w2, b2, force_streamed=True))
    err_s = float(jnp.max(jnp.abs(out_s.astype(f32) - ref)))
    assert jnp.allclose(out_s.astype(f32), ref, atol=2e-3, rtol=2e-3), err_s

    # 3) Streamed path with bf16 activations/output (exercises the f32 scratch accumulator).
    out_b = jax.block_until_ready(
        positionwise_feed_forward(x.astype(jnp.bfloat16), w1, b1, w2, b2,
                                  force_streamed=True))
    assert out_b.dtype == jnp.bfloat16
    err_b = float(jnp.max(jnp.abs(out_b.astype(f32) - ref)))
    assert jnp.allclose(out_b.astype(f32), ref, atol=5e-2, rtol=5e-2), err_b

    print("KERNEL_OK")
</pallas_src>

<mosaic_0001>
module attributes {stable_mosaic.version = 11 : i64} {
  func.func @ffn_kernel_resident(%arg0: i32, %arg1: memref<16x32xf32, #tpu.memory_space<vmem>>, %arg2: memref<32x64xbf16, #tpu.memory_space<vmem>>, %arg3: memref<1x64xf32, #tpu.memory_space<vmem>>, %arg4: memref<64x32xbf16, #tpu.memory_space<vmem>>, %arg5: memref<1x32xf32, #tpu.memory_space<vmem>>, %arg6: memref<16x32xf32, #tpu.memory_space<vmem>>) attributes {dimension_semantics = [#tpu.dimension_semantics<parallel>], iteration_bounds = array<i64: 1>, scalar_prefetch = 0 : i64, scratch_operands = 0 : i64, tpu.core_type = #tpu.core_type<tc>, window_params = [{transform_indices = @transform_0, window_bounds = array<i64: 16, 32>}, {pipeline_mode = #tpu.pipeline_mode<synchronous>, transform_indices = @transform_1, window_bounds = array<i64: 32, 64>}, {pipeline_mode = #tpu.pipeline_mode<synchronous>, transform_indices = @transform_2, window_bounds = array<i64: 1, 64>}, {pipeline_mode = #tpu.pipeline_mode<synchronous>, transform_indices = @transform_3, window_bounds = array<i64: 64, 32>}, {pipeline_mode = #tpu.pipeline_mode<synchronous>, transform_indices = @transform_4, window_bounds = array<i64: 1, 32>}, {transform_indices = @transform_5, window_bounds = array<i64: 16, 32>}]} {
    %c0 = arith.constant 0 : index
    %c0_0 = arith.constant 0 : index
    %0 = vector.load %arg1[%c0, %c0_0] : memref<16x32xf32, #tpu.memory_space<vmem>>, vector<16x32xf32>
    %1 = arith.truncf %0 : vector<16x32xf32> to vector<16x32xbf16>
    %c0_1 = arith.constant 0 : index
    %c0_2 = arith.constant 0 : index
    %2 = vector.load %arg2[%c0_1, %c0_2] : memref<32x64xbf16, #tpu.memory_space<vmem>>, vector<32x64xbf16>
    %cst = arith.constant dense<0.000000e+00> : vector<16x64xf32>
    %3 = tpu.matmul %1, %2, %cst {dimension_numbers = #tpu.dot_dimension_numbers<[1], [0], [0], [1], [0, 0, 1, 1], [], []>} : vector<16x32xbf16>, vector<32x64xbf16>, vector<16x64xf32> -> vector<16x64xf32>
    %c0_3 = arith.constant 0 : index
    %c0_4 = arith.constant 0 : index
    %4 = vector.load %arg3[%c0_3, %c0_4] : memref<1x64xf32, #tpu.memory_space<vmem>>, vector<1x64xf32>
    %5 = vector.broadcast %4 : vector<1x64xf32> to vector<16x64xf32>
    %6 = arith.addf %3, %5 : vector<16x64xf32>
    %cst_5 = arith.constant 0.000000e+00 : f32
    %7 = vector.broadcast %cst_5 : f32 to vector<16x64xf32>
    %8 = arith.maximumf %6, %7 : vector<16x64xf32>
    %9 = arith.truncf %8 : vector<16x64xf32> to vector<16x64xbf16>
    %c0_6 = arith.constant 0 : index
    %c0_7 = arith.constant 0 : index
    %10 = vector.load %arg4[%c0_6, %c0_7] : memref<64x32xbf16, #tpu.memory_space<vmem>>, vector<64x32xbf16>
    %cst_8 = arith.constant dense<0.000000e+00> : vector<16x32xf32>
    %11 = tpu.matmul %9, %10, %cst_8 {dimension_numbers = #tpu.dot_dimension_numbers<[1], [0], [0], [1], [0, 0, 1, 1], [], []>} : vector<16x64xbf16>, vector<64x32xbf16>, vector<16x32xf32> -> vector<16x32xf32>
    %c0_9 = arith.constant 0 : index
    %c0_10 = arith.constant 0 : index
    %12 = vector.load %arg5[%c0_9, %c0_10] : memref<1x32xf32, #tpu.memory_space<vmem>>, vector<1x32xf32>
    %13 = vector.broadcast %12 : vector<1x32xf32> to vector<16x32xf32>
    %14 = arith.addf %11, %13 : vector<16x32xf32>
    %c0_11 = arith.constant 0 : index
    %c0_12 = arith.constant 0 : index
    %15 = vector.load %arg6[%c0_11, %c0_12] : memref<16x32xf32, #tpu.memory_space<vmem>>, vector<16x32xf32>
    tpu.vector_store %arg6[%c0_11, %c0_12], %14 {strides = array<i32>} : memref<16x32xf32, #tpu.memory_space<vmem>>, vector<16x32xf32>,
    return
  }
  func.func @transform_0(%arg0: i32) -> (i32, i32) {
    %c0_i32 = arith.constant 0 : i32
    %c0_i32_0 = arith.constant 0 : i32
    return %arg0, %c0_i32 : i32, i32
  }
  func.func @transform_1(%arg0: i32) -> (i32, i32) {
    %c0_i32 = arith.constant 0 : i32
    %c0_i32_0 = arith.constant 0 : i32
    %c0_i32_1 = arith.constant 0 : i32
    return %c0_i32, %c0_i32_0 : i32, i32
  }
  func.func @transform_2(%arg0: i32) -> (i32, i32) {
    %c0_i32 = arith.constant 0 : i32
    %c0_i32_0 = arith.constant 0 : i32
    %c0_i32_1 = arith.constant 0 : i32
    return %c0_i32, %c0_i32_0 : i32, i32
  }
  func.func @transform_3(%arg0: i32) -> (i32, i32) {
    %c0_i32 = arith.constant 0 : i32
    %c0_i32_0 = arith.constant 0 : i32
    %c0_i32_1 = arith.constant 0 : i32
    return %c0_i32, %c0_i32_0 : i32, i32
  }
  func.func @transform_4(%arg0: i32) -> (i32, i32) {
    %c0_i32 = arith.constant 0 : i32
    %c0_i32_0 = arith.constant 0 : i32
    %c0_i32_1 = arith.constant 0 : i32
    return %c0_i32, %c0_i32_0 : i32, i32
  }
  func.func @transform_5(%arg0: i32) -> (i32, i32) {
    %c0_i32 = arith.constant 0 : i32
    %c0_i32_0 = arith.constant 0 : i32
    return %arg0, %c0_i32 : i32, i32
  }
}

</mosaic_0001>

<bundles_post_ra>
// kernel: tpu_custom_call.1
= control target key start
LH: loop header
LB: loop body
LE: loop exit
PB: predicated region body
PF: predicated region fallthrough
CT: control target
= control target key end

     0   :  { %v271_v1 = vmov 0.0   ;;  %vm272_vm0 = vmmov 0   ;;  %vm48_vm1 = vcmask 261120   ;;  %s351_s0 = inlined_call_operand.vmem [shape: f32[16,32], index: 0, kind: input, shape index: {}]   ;;  %s352_s1 = inlined_call_operand.vmem [shape: bf16[32,64], index: 1, kind: input, shape index: {}]   ;;  %s353_s2 = inlined_call_operand.vmem [shape: f32[1,64], index: 2, kind: input, shape index: {}]   ;;  %s354_s3 = inlined_call_operand.vmem [shape: bf16[64,32], index: 3, kind: input, shape index: {}]   ;;  %s355_s4 = inlined_call_operand.vmem [shape: f32[1,32], index: 4, kind: input, shape index: {}]   ;;  %s356_s5 = inlined_call_operand.hbm [shape: f32[16,32], index: 5, kind: output, shape index: {}]  }
   0x1   :  { %v241_v0 = vld [vmem:[%s352_s1] sm:$0xff]   ;;  %216 = vmatprep.subr.bf16.mxu0 %v271_v1  ;;  %v242_v2 = vld [vmem:[%s352_s1 + $0x8] sm:$0xff]   ;;  %224 = vmatprep.subr.bf16.mxu1 %v271_v1 }
   0x2   :  { %217 = vmatpush3.bf16.msra.mxu0 %v241_v0  ;;  %220 = vmatprep.mubr.msk.bf16.mxu0 %vm272_vm0, %v271_v1  ;;  %v22_v3 = vld [vmem:[%s351_s0] sm:$0xff]  ;;  %v23_v4 = vld [vmem:[%s351_s0 + $0x8] sm:$0xff] }
   0x3   :  { %218 = vmatprep.subr.bf16.mxu0 %v271_v1  ;;  %v243_v5 = vld [vmem:[%s354_s3] sm:$0xff]   ;;  %232 = vmatprep.mubr.msk.bf16.mxu1 %vm272_vm0, %v271_v1  ;;  %v244_v6 = vld [vmem:[%s354_s3 + $0x8] sm:$0xff]   ;;  %v24_v7 = vpack.c.bf16 %v23_v4, %v22_v3 }
   0x4   :  { %225 = vmatpush3.bf16.msra.mxu1 %v243_v5 }
   0x5   :  { %226 = vmatprep.subr.bf16.mxu1 %v271_v1 }
   0x6   :  { %219 = vmatpush3.bf16.msra.mxu0 %v242_v2 }
   0x7   :  { %10 = vsyncpa [#allocation3], 0  ;;  %v245_v8 = vld [vmem:[%s354_s3 + $0x10] sm:$0xff]   ;;  %v246_v9 = vld [vmem:[%s354_s3 + $0x18] sm:$0xff]   ;;  %vm135_vm2 = vcmask 523264   ;;  %s273_s3 = smov [#allocation2]  }
   0x8   :  { %227 = vmatpush3.bf16.msra.mxu1 %v244_v6  ;;  %v198_v10 = vld [vmem:[%s353_s2] ss:$0 sm:$0xff]  ;;  %s187_s11 = sshll.u32 %s273_s3, 4  ;;  %s188_s11 = int_to_ptr.vmem [resolvable:$true] %s187_s11 }
   0x9   :  { %221 = vmatmul.mubr.msk.bf16.vlgmr.msra.gmra.mrb[0].mxu0 %vm48_vm1, %v24_v7  ;;  %228 = vmatprep.subr.bf16.mxu1 %v271_v1  ;;  %v202_v20 = vld [vmem:[%s355_s4] ss:$0 sm:$0xff]  ;;  %s247_s2 = scalar_lea.vmem %s188_s11, 256  ;;  %p252_p1 = scmp.lt.s32.totalorder %s188_s11, %s188_s11 }
   0xa   :  { %p248_p0 = scmp.ne.s32.totalorder %s188_s11, %s247_s2  ;;  %p253_p2 = scmp.lt.s32.totalorder %s247_s2, %s247_s2 }
   0xc   :  { %229 = vmatpush3.bf16.msra.mxu1 %v245_v8  ;;  %p254_p3 = por %p253_p2, %p252_p1 }
   0xd   :  { %230 = vmatprep.subr.bf16.mxu1 %v271_v1 }
   0xe   :  { %p255_p4 = pnand %p254_p3, %p248_p0 }
  0x10   :  { %231 = vmatpush3.bf16.msra.mxu1 %v246_v9 }
  0xdc   :  { %v86_v11 = vpop.f32.mrb[0].mxu0 }
  0xdd   :  { %v87_v12 = vadd.f32 %v198_v10, %v86_v11  ;;  %v222_v13 = vpop.f32.mrb[1].mxu0 }
  0xde   :  { %v89_v14 = vpop.f32.mrb[2].mxu0 }
  0xdf   :  { %v90_v15 = vadd.f32 %v198_v10, %v89_v14  ;;  %v223_v16 = vpop.f32.mrb[3].mxu0  ;;  %v93_v17 = vmax.f32 %v87_v12, 0.0 }
  0xe1   :  { %v94_v18 = vmax.f32 %v90_v15, 0.0 }
  0xe3   :  { %v95_v19 = vpack.c.bf16 %v94_v18, %v93_v17 }
  0xe5   :  { %233 = vmatmul.mubr.msk.bf16.vlgmr.msra.gmra.mrb[0].mxu1 %vm135_vm2, %v95_v19 }
 0x1b8   :  { %v173_v21 = vpop.f32.mrb[0].mxu1 }
 0x1b9   :  { %v174_v22 = vadd.f32 %v202_v20, %v173_v21  ;;  %v234_v23 = vpop.f32.mrb[1].mxu1 }
 0x1ba   :  { %v176_v24 = vpop.f32.mrb[2].mxu1 }
 0x1bb   :  { %180 = vst.msk [vmem:[#allocation2] sm:$0xff] %vm48_vm1, %v174_v22  ;;  %v177_v25 = vadd.f32 %v202_v20, %v176_v24  ;;  %v235_v26 = vpop.f32.mrb[3].mxu1 }
 0x1bd   :  { %181 = vst.msk [vmem:[#allocation2 + $0x8] sm:$0xff] %vm48_vm1, %v177_v25 }
 0x1be   :  { %258 = shalt.err (!%p255_p4)
}
 0x1bf   :  { %s259_s13 = scalar_lea.hbm %s356_s5, 256 }
 0x1c0   :  { %p260_p5 = scmp.ne.s32.totalorder %s356_s5, %s259_s13  ;;  %p263_p6 = scmp.lt.u32.totalorder %s259_s13, %s356_s5 }
 0x1c2   :  { %p265_p7 = pnand %p263_p6, %p260_p5 }
 0x1c4   :  { %268 = shalt.err (!%p265_p7)
}
 0x1c5   :  { %s274_s18 = smov 128   ;;  %s275_s19 = smov 8  }
 0x1c6   :  { %193 = dma.vmem_to_hbm [thread:$0]  %s188_s11, 256, %s356_s5, [#allocation3], %s274_s18, %s274_s18, %s275_s19  }
 0x1c7   :  { %269 = dma.done.wait [#allocation3], 256  }
 0x1c8   :  { %270 = vsyncadd [#allocation3], 4294967040 }
 0x1c9   :  { %197 = vsyncpa [#allocation3], 1 }

</bundles_post_ra>
